<compile_context>
chip_gen: v7x
topology: tpu7x:2x2x1
jax: 0.10.0
libtpu: 0.0.40
codegen_flags: <defaults>
</compile_context>

<pallas_src>
import jax
import jax.numpy as jnp
from jax.experimental import pallas as pl
from jax.experimental.pallas import tpu as pltpu


def _round_up(x, m):
    return ((x + m - 1) // m) * m


def _pick_divisor(dim, candidates):
    for c in candidates:
        if dim % c == 0:
            return c
    return dim


def _linear_kernel_f32out(x_ref, w_ref, b_ref, o_ref):
    """y = x @ W + b, accumulating directly into the f32 output tile.

    x_ref: (tm, tk)  activations (input dtype, cast to compute dtype in-kernel)
    w_ref: (tk, tn)  weight, already (K, H)-oriented and compute-dtype
    b_ref: (1, tn)   f32 bias slice
    o_ref: (tm, tn)  f32 output tile, resident across the K grid axis
    """
    k = pl.program_id(2)

    @pl.when(k == 0)
    def _():
        o_ref[...] = jnp.zeros_like(o_ref)

    o_ref[...] += jnp.dot(
        x_ref[...].astype(w_ref.dtype), w_ref[...],
        preferred_element_type=jnp.float32,
    )

    @pl.when(k == pl.num_programs(2) - 1)
    def _():
        o_ref[...] += b_ref[...]


def _linear_kernel_acc(x_ref, w_ref, b_ref, o_ref, acc_ref):
    """Same math, with an f32 VMEM accumulator for non-f32 output dtypes."""
    k = pl.program_id(2)

    @pl.when(k == 0)
    def _():
        acc_ref[...] = jnp.zeros_like(acc_ref)

    acc_ref[...] += jnp.dot(
        x_ref[...].astype(w_ref.dtype), w_ref[...],
        preferred_element_type=jnp.float32,
    )

    @pl.when(k == pl.num_programs(2) - 1)
    def _():
        o_ref[...] = (acc_ref[...] + b_ref[...]).astype(o_ref.dtype)


def encoder_forward(x, weight, bias, *, compute_dtype=jnp.bfloat16,
                    tile_m=None, tile_n=None, tile_k=None):
    """Pallas equivalent of nn.Linear(input_size, hidden_size)(x).

    x:      (M, K) activations
    weight: (H, K) PyTorch layout (transposed once here, not per-tile)
    bias:   (H,)
    returns (M, H) in x.dtype
    """
    M, K = x.shape
    H, K2 = weight.shape
    assert K == K2, (K, K2)

    out_dtype = x.dtype
    xdt = jnp.dtype(x.dtype)
    cdt = jnp.dtype(compute_dtype)
    odt = jnp.dtype(out_dtype)

    # ---- Tile selection + padded problem dims --------------------------------
    if tile_m is not None:
        tm = tile_m
    elif M >= 256 and M % 256 == 0:
        tm = 256
    elif M >= 128:
        tm = 128
    else:
        tm = _round_up(M, 8)
    Mp = _round_up(M, tm)

    Hp = _round_up(H, 128)                     # lane-dense output stores
    tn = tile_n if tile_n is not None else _pick_divisor(Hp, (512, 384, 256, 128))
    # v7x: make sure the parallel grid has >= 2 blocks so both TCs get work.
    while (Mp // tm) * (Hp // tn) < 2 and tn >= 256 and tn % 256 == 0:
        tn //= 2

    Kp = _round_up(K, 128)
    tk = tile_k if tile_k is not None else _pick_divisor(
        Kp, (2048, 1536, 1024, 768, 512, 384, 256, 128))

    def step_bytes(tk_):
        b = 2 * (tm * tk_ * xdt.itemsize          # x tile, double-buffered
                 + tk_ * tn * cdt.itemsize        # W tile, double-buffered
                 + tn * 4)                        # bias slice
        b += 2 * tm * tn * odt.itemsize           # output tile
        if odt != jnp.float32:
            b += tm * tn * 4                      # f32 accumulator scratch
        return b

    # Stay comfortably under the v7x 64 MiB / 32 MiB-scoped VMEM ceiling.
    budget = 24 << 20
    while step_bytes(tk) > budget and tk > 128 and tk % 256 == 0:
        tk //= 2
    vmem_limit = min(max(int(step_bytes(tk) * 1.5) + (2 << 20), 16 << 20), 48 << 20)

    # ---- Operand prep (one-time, outside the grid) ---------------------------
    # (K, H) orientation + bf16 cast happen once; the kernel never transposes.
    w_t = weight.T.astype(compute_dtype)
    if (Kp, Hp) != (K, H):
        w_t = jnp.pad(w_t, ((0, Kp - K), (0, Hp - H)))
    x_p = x if (Mp, Kp) == (M, K) else jnp.pad(x, ((0, Mp - M), (0, Kp - K)))
    b_p = bias if Hp == H else jnp.pad(bias, (0, Hp - H))
    b_p = b_p.reshape(1, Hp).astype(jnp.float32)

    gm, gn, gk = Mp // tm, Hp // tn, Kp // tk

    if odt == jnp.float32:
        kernel = _linear_kernel_f32out
        scratch_shapes = []
    else:
        kernel = _linear_kernel_acc
        scratch_shapes = [pltpu.VMEM((tm, tn), jnp.float32)]

    cost = pl.CostEstimate(
        flops=2 * Mp * Kp * Hp,
        bytes_accessed=(gn * Mp * Kp * xdt.itemsize      # x re-read per j block
                        + gm * Kp * Hp * cdt.itemsize    # W re-read per i block
                        + Mp * Hp * odt.itemsize),
        transcendentals=0,
    )

    out_p = pl.pallas_call(
        kernel,
        out_shape=jax.ShapeDtypeStruct((Mp, Hp), out_dtype),
        grid_spec=pltpu.PrefetchScalarGridSpec(
            num_scalar_prefetch=0,
            grid=(gm, gn, gk),
            in_specs=[
                pl.BlockSpec((tm, tk), lambda i, j, k: (i, k)),   # x tile
                pl.BlockSpec((tk, tn), lambda i, j, k: (k, j)),   # W (K,H) tile
                pl.BlockSpec((1, tn), lambda i, j, k: (0, j)),    # bias slice
            ],
            out_specs=pl.BlockSpec((tm, tn), lambda i, j, k: (i, j)),
            scratch_shapes=scratch_shapes,
        ),
        compiler_params=pltpu.CompilerParams(
            dimension_semantics=("parallel", "parallel", "arbitrary"),
            vmem_limit_bytes=vmem_limit,
        ),
        cost_estimate=cost,
    )(x_p, w_t, b_p)

    if (Mp, Hp) != (M, H):
        out_p = out_p[:M, :H]
    return out_p


if __name__ == "__main__":
    # Small shapes consistent with the module: batch=8, input_size=32, hidden=64.
    batch, input_size, hidden_size = 8, 32, 64

    key = jax.random.PRNGKey(0)
    kx, kw, kb = jax.random.split(key, 3)

    x = jax.random.normal(kx, (batch, input_size), dtype=jnp.float32)
    # Deterministic init mimicking nn.Linear's uniform(-1/sqrt(in), 1/sqrt(in))
    bound = 1.0 / (input_size ** 0.5)
    weight = jax.random.uniform(kw, (hidden_size, input_size),
                                minval=-bound, maxval=bound, dtype=jnp.float32)
    bias = jax.random.uniform(kb, (hidden_size,),
                              minval=-bound, maxval=bound, dtype=jnp.float32)

    out = encoder_forward(x, weight, bias)
    out = jax.block_until_ready(out)

    # Reference: same math as torch.nn.Linear (bf16 MXU path -> loose tolerance).
    ref_f32 = x @ weight.T + bias
    ref_bf16 = jnp.dot(x.astype(jnp.bfloat16), weight.T.astype(jnp.bfloat16),
                       preferred_element_type=jnp.float32) + bias
    assert out.shape == (batch, hidden_size)
    assert jnp.allclose(out, ref_bf16, atol=2e-3, rtol=2e-3)
    assert jnp.allclose(out, ref_f32, atol=3e-2, rtol=3e-2)

    print("KERNEL_OK")
</pallas_src>

<mosaic_0001>
module attributes {stable_mosaic.version = 11 : i64} {
  func.func @_linear_kernel_f32out(%arg0: i32, %arg1: i32, %arg2: i32, %arg3: memref<8x128xf32, #tpu.memory_space<vmem>>, %arg4: memref<128x128xbf16, #tpu.memory_space<vmem>>, %arg5: memref<1x128xf32, #tpu.memory_space<vmem>>, %arg6: memref<8x128xf32, #tpu.memory_space<vmem>>) attributes {dimension_semantics = [#tpu.dimension_semantics<parallel>, #tpu.dimension_semantics<parallel>, #tpu.dimension_semantics<arbitrary>], iteration_bounds = array<i64: 1, 1, 1>, scalar_prefetch = 0 : i64, scratch_operands = 0 : i64, tpu.core_type = #tpu.core_type<tc>, window_params = [{transform_indices = @transform_0, window_bounds = array<i64: 8, 128>}, {transform_indices = @transform_1, window_bounds = array<i64: 128, 128>}, {transform_indices = @transform_2, window_bounds = array<i64: 1, 128>}, {transform_indices = @transform_3, window_bounds = array<i64: 8, 128>}]} {
    %c0_i32 = arith.constant 0 : i32
    %0 = arith.cmpi eq, %arg2, %c0_i32 : i32
    %1 = arith.extui %0 : i1 to i32
    %c0_i32_0 = arith.constant 0 : i32
    %2 = arith.cmpi ne, %1, %c0_i32_0 : i32
    scf.if %2 {
      %cst_10 = arith.constant 0.000000e+00 : f32
      %13 = vector.broadcast %cst_10 : f32 to vector<8x128xf32>
      %c0_11 = arith.constant 0 : index
      %c0_12 = arith.constant 0 : index
      %14 = vector.load %arg6[%c0_11, %c0_12] : memref<8x128xf32, #tpu.memory_space<vmem>>, vector<8x128xf32>
      tpu.vector_store %arg6[%c0_11, %c0_12], %13 {strides = array<i32>} : memref<8x128xf32, #tpu.memory_space<vmem>>, vector<8x128xf32>,
    } else {
    }
    %c0 = arith.constant 0 : index
    %c0_1 = arith.constant 0 : index
    %3 = vector.load %arg6[%c0, %c0_1] : memref<8x128xf32, #tpu.memory_space<vmem>>, vector<8x128xf32>
    %c0_2 = arith.constant 0 : index
    %c0_3 = arith.constant 0 : index
    %4 = vector.load %arg3[%c0_2, %c0_3] : memref<8x128xf32, #tpu.memory_space<vmem>>, vector<8x128xf32>
    %5 = arith.truncf %4 : vector<8x128xf32> to vector<8x128xbf16>
    %c0_4 = arith.constant 0 : index
    %c0_5 = arith.constant 0 : index
    %6 = vector.load %arg4[%c0_4, %c0_5] : memref<128x128xbf16, #tpu.memory_space<vmem>>, vector<128x128xbf16>
    %cst = arith.constant dense<0.000000e+00> : vector<8x128xf32>
    %7 = tpu.matmul %5, %6, %cst {dimension_numbers = #tpu.dot_dimension_numbers<[1], [0], [0], [1], [0, 0, 1, 1], [], []>} : vector<8x128xbf16>, vector<128x128xbf16>, vector<8x128xf32> -> vector<8x128xf32>
    %8 = arith.addf %3, %7 : vector<8x128xf32>
    %c0_6 = arith.constant 0 : index
    %c0_7 = arith.constant 0 : index
    %9 = vector.load %arg6[%c0_6, %c0_7] : memref<8x128xf32, #tpu.memory_space<vmem>>, vector<8x128xf32>
    tpu.vector_store %arg6[%c0_6, %c0_7], %8 {strides = array<i32>} : memref<8x128xf32, #tpu.memory_space<vmem>>, vector<8x128xf32>,
    %c0_i32_8 = arith.constant 0 : i32
    %10 = arith.cmpi eq, %arg2, %c0_i32_8 : i32
    %11 = arith.extui %10 : i1 to i32
    %c0_i32_9 = arith.constant 0 : i32
    %12 = arith.cmpi ne, %11, %c0_i32_9 : i32
    scf.if %12 {
      %c0_10 = arith.constant 0 : index
      %c0_11 = arith.constant 0 : index
      %13 = vector.load %arg6[%c0_10, %c0_11] : memref<8x128xf32, #tpu.memory_space<vmem>>, vector<8x128xf32>
      %c0_12 = arith.constant 0 : index
      %c0_13 = arith.constant 0 : index
      %14 = vector.load %arg5[%c0_12, %c0_13] : memref<1x128xf32, #tpu.memory_space<vmem>>, vector<1x128xf32>
      %15 = vector.broadcast %14 : vector<1x128xf32> to vector<8x128xf32>
      %16 = arith.addf %13, %15 : vector<8x128xf32>
      %c0_14 = arith.constant 0 : index
      %c0_15 = arith.constant 0 : index
      %17 = vector.load %arg6[%c0_14, %c0_15] : memref<8x128xf32, #tpu.memory_space<vmem>>, vector<8x128xf32>
      tpu.vector_store %arg6[%c0_14, %c0_15], %16 {strides = array<i32>} : memref<8x128xf32, #tpu.memory_space<vmem>>, vector<8x128xf32>,
    } else {
    }
    return
  }
  func.func @transform_0(%arg0: i32, %arg1: i32, %arg2: i32) -> (i32, i32) {
    %c0_i32 = arith.constant 0 : i32
    return %arg0, %arg2 : i32, i32
  }
  func.func @transform_1(%arg0: i32, %arg1: i32, %arg2: i32) -> (i32, i32) {
    %c0_i32 = arith.constant 0 : i32
    return %arg2, %arg1 : i32, i32
  }
  func.func @transform_2(%arg0: i32, %arg1: i32, %arg2: i32) -> (i32, i32) {
    %c0_i32 = arith.constant 0 : i32
    %c0_i32_0 = arith.constant 0 : i32
    return %c0_i32, %arg1 : i32, i32
  }
  func.func @transform_3(%arg0: i32, %arg1: i32, %arg2: i32) -> (i32, i32) {
    %c0_i32 = arith.constant 0 : i32
    return %arg0, %arg1 : i32, i32
  }
}

</mosaic_0001>

<bundles_post_ra>
// kernel: tpu_custom_call.1
= control target key start
LH: loop header
LB: loop body
LE: loop exit
PB: predicated region body
PF: predicated region fallthrough
CT: control target
= control target key end

     0   :  { %8 = vsyncpa [#allocation3], 0  ;;  %s383_s0 = inlined_call_operand.hbm [shape: f32[8,128], index: 0, kind: input, shape index: {}]   ;;  %s384_s1 = inlined_call_operand.hbm [shape: bf16[128,128], index: 1, kind: input, shape index: {}]   ;;  %s385_s2 = inlined_call_operand.vmem [shape: f32[1,128], index: 2, kind: input, shape index: {}]   ;;  %s386_s3 = inlined_call_operand.hbm [shape: f32[8,128], index: 3, kind: output, shape index: {}]  }
   0x1   :  { %9 = vsyncpa [#allocation6], 0 }
   0x2   :  { %10 = vsyncpa [#allocation4], 0  ;;  %s310_s12 = smov [#allocation2]   ;;  %s311_s14 = smov [#allocation5]  }
   0x3   :  { %s17_s13 = sshll.u32 %s310_s12, 4  ;;  %s26_s15 = sshll.u32 %s311_s14, 4  ;;  %s18_s13 = int_to_ptr.vmem [resolvable:$true] %s17_s13  ;;  %s337_s15 = int_to_ptr.vmem [resolvable:$true] %s26_s15 }
   0x4   :  { %s238_s18 = scalar_lea.hbm %s383_s0, 128 }
   0x5   :  { %p239_p0 = scmp.ne.s32.totalorder %s383_s0, %s238_s18  ;;  %p242_p1 = scmp.lt.u32.totalorder %s238_s18, %s383_s0 }
   0x7   :  { %p244_p2 = pnand %p242_p1, %p239_p0 }
   0x9   :  { %247 = shalt.err (!%p244_p2)
}
   0xa   :  { %s248_s23 = scalar_lea.vmem %s18_s13, 128  ;;  %p253_p4 = scmp.lt.s32.totalorder %s18_s13, %s18_s13 }
   0xb   :  { %p249_p3 = scmp.ne.s32.totalorder %s18_s13, %s248_s23  ;;  %p254_p5 = scmp.lt.s32.totalorder %s248_s23, %s248_s23 }
   0xd   :  { %p255_p6 = por %p254_p5, %p253_p4 }
   0xf   :  { %p256_p7 = pnand %p255_p6, %p249_p3 }
  0x11   :  { %259 = shalt.err (!%p256_p7)
}
  0x12   :  { %20 = dma.hbm_to_vmem [thread:$0]  %s383_s0, 128, %s18_s13, [#allocation3]  }
  0x13   :  { %s260_s28 = scalar_lea.hbm %s384_s1, 1024 }
  0x14   :  { %p261_p8 = scmp.ne.s32.totalorder %s384_s1, %s260_s28  ;;  %p264_p9 = scmp.lt.u32.totalorder %s260_s28, %s384_s1 }
  0x16   :  { %p266_p10 = pnand %p264_p9, %p261_p8 }
  0x18   :  { %269 = shalt.err (!%p266_p10)
}
  0x19   :  { %s270_s6 = scalar_lea.vmem %s337_s15, 1024  ;;  %p275_p12 = scmp.lt.s32.totalorder %s337_s15, %s337_s15 }
  0x1a   :  { %p271_p11 = scmp.ne.s32.totalorder %s337_s15, %s270_s6  ;;  %p276_p13 = scmp.lt.s32.totalorder %s270_s6, %s270_s6 }
  0x1c   :  { %p277_p0 = por %p276_p13, %p275_p12 }
  0x1e   :  { %p278_p1 = pnand %p277_p0, %p271_p11 }
  0x20   :  { %281 = shalt.err (!%p278_p1)
}
  0x21   :  { %s312_s0 = smov 64   ;;  %s313_s7 = smov 4  }
  0x22   :  { %32 = dma.hbm_to_vmem [thread:$0]  %s384_s1, 1024, %s337_s15, [#allocation6], %s312_s0, %s312_s0, %s313_s7  }
  0x23   :  { %304 = dma.done.wait [#allocation3], 128  }
  0x24   :  { %305 = vsyncadd [#allocation3], 4294967168 }
  0x25   :  { %306 = dma.done.wait [#allocation6], 1024  }
  0x26   :  { %307 = vsyncadd [#allocation6], 4294966272  ;;  %v314_v0 = vmov 0.0   ;;  %vm315_vm0 = vmmov 0   ;;  %v230_v1 = vld [vmem:[#allocation5] sm:$0xff]   ;;  %v231_v2 = vld [vmem:[#allocation5 + $0x8] sm:$0xff]  }
  0x27   :  { %203 = vmatprep.subr.bf16.mxu0 %v314_v0  ;;  %219 = vmatprep.mubr.msk.bf16.mxu0 %vm315_vm0, %v314_v0  ;;  %v232_v3 = vld [vmem:[#allocation5 + $0x10] sm:$0xff]   ;;  %v233_v4 = vld [vmem:[#allocation5 + $0x18] sm:$0xff]   ;;  %v234_v5 = vld [vmem:[#allocation5 + $0x20] sm:$0xff]   ;;  %s316_s11 = smov [#allocation7]  }
  0x28   :  { %204 = vmatpush3.bf16.msra.mxu0 %v230_v1  ;;  %v235_v6 = vld [vmem:[#allocation5 + $0x28] sm:$0xff]   ;;  %v236_v7 = vld [vmem:[#allocation5 + $0x30] sm:$0xff]   ;;  %v237_v8 = vld [vmem:[#allocation5 + $0x38] sm:$0xff]   ;;  %s175_s12 = sshll.u32 %s316_s11, 4  ;;  %s176_s12 = int_to_ptr.vmem [resolvable:$true] %s175_s12 }
  0x29   :  { %205 = vmatprep.subr.bf16.mxu0 %v314_v0  ;;  %v48_v9 = vld [vmem:[#allocation2] sm:$0xff]  ;;  %s282_s13 = scalar_lea.vmem %s176_s12, 128  ;;  %p287_p3 = scmp.lt.s32.totalorder %s176_s12, %s176_s12 }
  0x2a   :  { %v49_v10 = vpack.c.bf16 %v48_v9, %v48_v9  ;;  %v193_v12 = vld [vmem:[%s385_s2] ss:$0 sm:$0xff]  ;;  %p283_p2 = scmp.ne.s32.totalorder %s176_s12, %s282_s13  ;;  %p288_p4 = scmp.lt.s32.totalorder %s282_s13, %s282_s13 }
  0x2c   :  { %206 = vmatpush3.bf16.msra.mxu0 %v231_v2  ;;  %p289_p5 = por %p288_p4, %p287_p3 }
  0x2d   :  { %207 = vmatprep.subr.bf16.mxu0 %v314_v0 }
  0x2e   :  { %p290_p6 = pnand %p289_p5, %p283_p2 }
  0x30   :  { %208 = vmatpush3.bf16.msra.mxu0 %v232_v3 }
  0x31   :  { %209 = vmatprep.subr.bf16.mxu0 %v314_v0 }
  0x34   :  { %210 = vmatpush3.bf16.msra.mxu0 %v233_v4 }
  0x35   :  { %211 = vmatprep.subr.bf16.mxu0 %v314_v0 }
  0x38   :  { %212 = vmatpush3.bf16.msra.mxu0 %v234_v5 }
  0x39   :  { %213 = vmatprep.subr.bf16.mxu0 %v314_v0 }
  0x3c   :  { %214 = vmatpush3.bf16.msra.mxu0 %v235_v6 }
  0x3d   :  { %215 = vmatprep.subr.bf16.mxu0 %v314_v0 }
  0x40   :  { %216 = vmatpush3.bf16.msra.mxu0 %v236_v7 }
  0x41   :  { %217 = vmatprep.subr.bf16.mxu0 %v314_v0 }
  0x44   :  { %218 = vmatpush3.bf16.msra.mxu0 %v237_v8 }
  0x47   :  { %220 = vmatmul.mubr.bf16.vlgmr.msra.gmra.mrb[0].mxu0 %v49_v10 }
 0x11a   :  { %v148_v11 = vpop.f32.mrb[0].mxu0 }
 0x11b   :  { %v221_v13 = vpop.f32.mrb[1].mxu0  ;;  %v167_v16 = vadd.f32 %v193_v12, %v148_v11 }
 0x11c   :  { %v151_v14 = vpop.f32.mrb[2].mxu0 }
 0x11d   :  { %v222_v15 = vpop.f32.mrb[3].mxu0  ;;  %168 = vst [vmem:[#allocation7] sm:$0xff] %v167_v16 }
 0x11e   :  { %293 = shalt.err (!%p290_p6)
}
 0x11f   :  { %s294_s16 = scalar_lea.hbm %s386_s3, 128 }
 0x120   :  { %p295_p7 = scmp.ne.s32.totalorder %s386_s3, %s294_s16  ;;  %p298_p8 = scmp.lt.u32.totalorder %s294_s16, %s386_s3 }
 0x122   :  { %p300_p9 = pnand %p298_p8, %p295_p7 }
 0x124   :  { %303 = shalt.err (!%p300_p9)
}
 0x125   :  { %178 = dma.vmem_to_hbm [thread:$0]  %s176_s12, 128, %s386_s3, [#allocation4]  }
 0x126   :  { %308 = dma.done.wait [#allocation4], 128  }
 0x127   :  { %309 = vsyncadd [#allocation4], 4294967168 }
 0x128   :  { %182 = vsyncpa [#allocation3], 1 }
 0x129   :  { %183 = vsyncpa [#allocation6], 1 }
 0x12a   :  { %184 = vsyncpa [#allocation4], 1 }

</bundles_post_ra>
